<compile_context>
chip_gen: v5e
topology: v5e:2x2
jax: 0.10.0
libtpu: 0.0.40
codegen_flags: <defaults>
</compile_context>

<pallas_src>
import math
import functools

import jax
import jax.numpy as jnp
import numpy as np
from jax.experimental import pallas as pl
from jax.experimental.pallas import tpu as pltpu


# -----------------------------------------------------------------------------
# QKVAttention Pallas kernel
# -----------------------------------------------------------------------------
def _qkv_attention_kernel(q_ref, k_ref, v_ref, o_ref, *, scale):
    # q_ref / k_ref / v_ref / o_ref: [1, BB, C, T] blocks (BB heads per step).
    q = q_ref[0]                       # [BB, C, T]  (input dtype: f32 or bf16)
    k = k_ref[0]                       # [BB, C, T]
    v = v_ref[0]                       # [BB, C, T]

    # scores[b, t, s] = sum_c q[b, c, t] * k[b, c, s]  (MXU, f32 accumulation).
    # Operands stay in the input dtype; the PyTorch (q*scale)·(k*scale) is
    # applied once as scale^2 on the f32 scores.
    q_t = jnp.swapaxes(q, 1, 2)        # [BB, T, C] — cheap in-VMEM transpose
    w = jnp.einsum("btc,bcs->bts", q_t, k,
                   preferred_element_type=jnp.float32)        # [BB, T, T] f32
    w = w * (scale * scale)

    # Softmax over the key axis in f32 (matches th.softmax(weight.float(), -1)).
    # TODO(synk): for very large T (big feature maps), tile the key/value axis
    # with an online-softmax accumulator instead of materializing [BB, T, T].
    w = w - jnp.max(w, axis=-1, keepdims=True)
    w = jnp.exp(w)
    w = w / jnp.sum(w, axis=-1, keepdims=True)
    w = w.astype(v.dtype)

    # a[b, c, t] = sum_s v[b, c, s] * w[b, t, s]  (contract last-with-last),
    # result already in the channel-major [BB, C, T] output layout.
    a = jnp.einsum("bcs,bts->bct", v, w,
                   preferred_element_type=jnp.float32)        # [BB, C, T] f32
    o_ref[0] = a.astype(o_ref.dtype)


def _choose_heads_per_block(n_heads, ch, seq_len, itemsize,
                            vmem_budget_bytes=12 * 1024 * 1024):
    """Largest divisor of n_heads whose per-block VMEM footprint fits the budget.

    Footprint: 3 inputs + 1 output of BB*ch*T*itemsize, double-buffered, plus
    the f32 [BB, T, T] scores and softmax temporaries (~3x).  The 12 MiB budget
    stays well inside the 32 MiB default scoped-VMEM limit and leaves headroom
    on v7x (64 MiB physical VMEM per TensorCore).
    """
    best = 1
    for bb in range(1, n_heads + 1):
        if n_heads % bb:
            continue
        io_bytes = 4 * 2 * bb * ch * seq_len * itemsize
        score_bytes = 3 * bb * seq_len * seq_len * 4
        if io_bytes + score_bytes <= vmem_budget_bytes:
            best = bb
    return best


def qkv_attention(qkv, n_heads, *, heads_per_block=None):
    """QKVAttention forward.  qkv: [N, 3*H*C, T] -> [N, H*C, T]."""
    N, width, T = qkv.shape
    assert width % (3 * n_heads) == 0
    ch = width // (3 * n_heads)
    scale = 1.0 / math.sqrt(math.sqrt(ch))

    if heads_per_block is None:
        heads_per_block = _choose_heads_per_block(
            n_heads, ch, T, jnp.dtype(qkv.dtype).itemsize)
    assert n_heads % heads_per_block == 0
    hb_count = n_heads // heads_per_block       # head blocks per batch element

    # Free (metadata-only) reshape: channel axis -> (3*H, C).  q heads occupy
    # rows [0, H), k rows [H, 2H), v rows [2H, 3H) of axis 1.
    qkv4 = qkv.reshape(N, 3 * n_heads, ch, T)

    blk = (1, heads_per_block, ch, T)
    q_spec = pl.BlockSpec(blk, lambda n, h: (n, h, 0, 0))
    k_spec = pl.BlockSpec(blk, lambda n, h: (n, hb_count + h, 0, 0))
    v_spec = pl.BlockSpec(blk, lambda n, h: (n, 2 * hb_count + h, 0, 0))
    o_spec = pl.BlockSpec(blk, lambda n, h: (n, h, 0, 0))

    out4 = pl.pallas_call(
        functools.partial(_qkv_attention_kernel, scale=scale),
        out_shape=jax.ShapeDtypeStruct((N, n_heads, ch, T), qkv.dtype),
        grid_spec=pltpu.PrefetchScalarGridSpec(
            num_scalar_prefetch=0,
            grid=(N, hb_count),
            in_specs=[q_spec, k_spec, v_spec],
            out_specs=o_spec,
        ),
        compiler_params=pltpu.CompilerParams(
            # Both grid axes are independent: on v7x the two TensorCores split
            # them; on v5e/v6e this is a no-op.
            dimension_semantics=("parallel", "parallel")),
    )(qkv4, qkv4, qkv4)

    # Free reshape back to the PyTorch channel-major [N, H*C, T] layout.
    return out4.reshape(N, n_heads * ch, T)


def qkv_attention_ref(qkv, n_heads):
    """Pure-JAX reference mirroring the PyTorch QKVAttention.forward."""
    N, width, T = qkv.shape
    ch = width // (3 * n_heads)
    q, k, v = jnp.split(qkv, 3, axis=1)
    scale = 1.0 / math.sqrt(math.sqrt(ch))
    qh = (q * scale).reshape(N * n_heads, ch, T)
    kh = (k * scale).reshape(N * n_heads, ch, T)
    vh = v.reshape(N * n_heads, ch, T)
    w = jnp.einsum("bct,bcs->bts", qh, kh)
    w = jax.nn.softmax(w.astype(jnp.float32), axis=-1).astype(w.dtype)
    a = jnp.einsum("bts,bcs->bct", w, vh)
    return a.reshape(N, -1, T)


# -----------------------------------------------------------------------------
# AttentionPool2d forward (glue around the Pallas attention kernel)
# -----------------------------------------------------------------------------
def attention_pool_2d(x, pos_emb, qkv_w, qkv_b, c_w, c_b, num_heads,
                      attention_fn=qkv_attention):
    """AttentionPool2d.forward.  x: [N, C, H, W] -> [N, output_dim]."""
    n, c = x.shape[0], x.shape[1]
    x = x.reshape(n, c, -1)                                        # [N, C, HW]
    x = jnp.concatenate([jnp.mean(x, axis=-1, keepdims=True), x], axis=-1)
    x = x + pos_emb[None].astype(x.dtype)                          # [N, C, T]
    # 1x1 conv1d == channel matmul.
    # TODO(synk): optionally fuse qkv_proj / c_proj into the Pallas kernel.
    qkv = jnp.einsum("oc,nct->not", qkv_w, x) + qkv_b[None, :, None]
    a = attention_fn(qkv, num_heads)                               # [N, C, T]
    out = jnp.einsum("oc,nct->not", c_w, a) + c_b[None, :, None]
    return out[:, :, 0]                                            # [N, out_dim]


if __name__ == "__main__":
    # Small AttentionPool2d config: N=2, embed_dim=32, head_channels=8
    # (-> 4 heads, ch=8), spacial_dim=4 (-> T = 4*4 + 1 = 17), output_dim=16.
    N = 2
    embed_dim = 32
    num_heads_channels = 8
    spacial_dim = 4
    output_dim = 16
    num_heads = embed_dim // num_heads_channels
    T = spacial_dim ** 2 + 1

    key = jax.random.PRNGKey(0)
    k1, k2, k3, k4, k5, k6 = jax.random.split(key, 6)
    x = jax.random.normal(k1, (N, embed_dim, spacial_dim, spacial_dim), jnp.float32)
    pos_emb = jax.random.normal(k2, (embed_dim, T), jnp.float32) / embed_dim ** 0.5
    qkv_w = jax.random.normal(k3, (3 * embed_dim, embed_dim), jnp.float32) / embed_dim ** 0.5
    qkv_b = jax.random.normal(k4, (3 * embed_dim,), jnp.float32) * 0.1
    c_w = jax.random.normal(k5, (output_dim, embed_dim), jnp.float32) / embed_dim ** 0.5
    c_b = jax.random.normal(k6, (output_dim,), jnp.float32) * 0.1

    # Full AttentionPool2d forward with the Pallas attention kernel.
    out = attention_pool_2d(x, pos_emb, qkv_w, qkv_b, c_w, c_b, num_heads,
                            attention_fn=qkv_attention)
    out = jax.block_until_ready(out)

    ref = attention_pool_2d(x, pos_emb, qkv_w, qkv_b, c_w, c_b, num_heads,
                            attention_fn=qkv_attention_ref)
    ref = jax.block_until_ready(ref)

    np.testing.assert_allclose(np.asarray(out), np.asarray(ref),
                               rtol=1e-5, atol=1e-5)
    assert out.shape == (N, output_dim)

    # Also check the attention kernel on its own at a second shape.
    qkv2 = jax.random.normal(jax.random.PRNGKey(1), (2, 3 * 4 * 8, 64), jnp.float32)
    a_pl = jax.block_until_ready(qkv_attention(qkv2, 4))
    a_rf = jax.block_until_ready(qkv_attention_ref(qkv2, 4))
    np.testing.assert_allclose(np.asarray(a_pl), np.asarray(a_rf),
                               rtol=1e-5, atol=1e-5)

    print("KERNEL_OK")
</pallas_src>

<mosaic_0001>
module attributes {stable_mosaic.version = 11 : i64} {
  func.func @_qkv_attention_kernel(%arg0: i32, %arg1: i32, %arg2: memref<1x4x8x17xf32, #tpu.memory_space<vmem>>, %arg3: memref<1x4x8x17xf32, #tpu.memory_space<vmem>>, %arg4: memref<1x4x8x17xf32, #tpu.memory_space<vmem>>, %arg5: memref<1x4x8x17xf32, #tpu.memory_space<vmem>>) attributes {dimension_semantics = [#tpu.dimension_semantics<parallel>, #tpu.dimension_semantics<parallel>], iteration_bounds = array<i64: 2, 1>, scalar_prefetch = 0 : i64, scratch_operands = 0 : i64, tpu.core_type = #tpu.core_type<tc>, window_params = [{transform_indices = @transform_0, window_bounds = array<i64: 1, 4, 8, 17>}, {transform_indices = @transform_1, window_bounds = array<i64: 1, 4, 8, 17>}, {transform_indices = @transform_2, window_bounds = array<i64: 1, 4, 8, 17>}, {transform_indices = @transform_3, window_bounds = array<i64: 1, 4, 8, 17>}]} {
    %c0 = arith.constant 0 : index
    %c0_0 = arith.constant 0 : index
    %c0_1 = arith.constant 0 : index
    %c0_2 = arith.constant 0 : index
    %0 = vector.load %arg2[%c0, %c0_0, %c0_1, %c0_2] : memref<1x4x8x17xf32, #tpu.memory_space<vmem>>, vector<1x4x8x17xf32>
    %1 = vector.shape_cast %0 : vector<1x4x8x17xf32> to vector<4x8x17xf32>
    %c0_3 = arith.constant 0 : index
    %c0_4 = arith.constant 0 : index
    %c0_5 = arith.constant 0 : index
    %c0_6 = arith.constant 0 : index
    %2 = vector.load %arg3[%c0_3, %c0_4, %c0_5, %c0_6] : memref<1x4x8x17xf32, #tpu.memory_space<vmem>>, vector<1x4x8x17xf32>
    %3 = vector.shape_cast %2 : vector<1x4x8x17xf32> to vector<4x8x17xf32>
    %c0_7 = arith.constant 0 : index
    %c0_8 = arith.constant 0 : index
    %c0_9 = arith.constant 0 : index
    %c0_10 = arith.constant 0 : index
    %4 = vector.load %arg4[%c0_7, %c0_8, %c0_9, %c0_10] : memref<1x4x8x17xf32, #tpu.memory_space<vmem>>, vector<1x4x8x17xf32>
    %5 = vector.shape_cast %4 : vector<1x4x8x17xf32> to vector<4x8x17xf32>
    %6 = tpu.transpose %1, [0, 2, 1] : vector<4x8x17xf32> -> vector<4x17x8xf32>
    "tpu.trace_start"() <{level = 10 : i32, message = "btc,bcs->bts"}> : () -> ()
    %cst = arith.constant dense<0.000000e+00> : vector<4x17x17xf32>
    %7 = tpu.matmul %6, %3, %cst {dimension_numbers = #tpu.dot_dimension_numbers<[2], [1], [1], [2], [0, 0, 0, 1, 1, 2], [0], [0]>} : vector<4x17x8xf32>, vector<4x8x17xf32>, vector<4x17x17xf32> -> vector<4x17x17xf32>
    "tpu.trace_stop"() : () -> ()
    %cst_11 = arith.constant 0.353553385 : f32
    %8 = vector.broadcast %cst_11 : f32 to vector<4x17x17xf32>
    %9 = arith.mulf %7, %8 : vector<4x17x17xf32>
    %cst_12 = arith.constant dense<0xFF800000> : vector<4x17xf32>
    %10 = vector.multi_reduction <maximumf>, %9, %cst_12 [2] : vector<4x17x17xf32> to vector<4x17xf32>
    %11 = vector.shape_cast %10 : vector<4x17xf32> to vector<4x17x1xf32>
    %12 = vector.broadcast %11 : vector<4x17x1xf32> to vector<4x17x17xf32>
    %13 = arith.subf %9, %12 : vector<4x17x17xf32>
    %14 = math.exp %13 : vector<4x17x17xf32>
    %cst_13 = arith.constant dense<0.000000e+00> : vector<4x17xf32>
    %15 = vector.multi_reduction <add>, %14, %cst_13 [2] : vector<4x17x17xf32> to vector<4x17xf32>
    %16 = vector.shape_cast %15 : vector<4x17xf32> to vector<4x17x1xf32>
    %17 = vector.broadcast %16 : vector<4x17x1xf32> to vector<4x17x17xf32>
    %18 = arith.divf %14, %17 : vector<4x17x17xf32>
    "tpu.trace_start"() <{level = 10 : i32, message = "bcs,bts->bct"}> : () -> ()
    %cst_14 = arith.constant dense<0.000000e+00> : vector<4x8x17xf32>
    %19 = tpu.matmul %5, %18, %cst_14 {dimension_numbers = #tpu.dot_dimension_numbers<[2], [2], [1], [1], [0, 0, 0, 1, 1, 1], [0], [0]>} : vector<4x8x17xf32>, vector<4x17x17xf32>, vector<4x8x17xf32> -> vector<4x8x17xf32>
    "tpu.trace_stop"() : () -> ()
    %c0_15 = arith.constant 0 : index
    %c0_16 = arith.constant 0 : index
    %c0_17 = arith.constant 0 : index
    %c0_18 = arith.constant 0 : index
    %20 = vector.load %arg5[%c0_15, %c0_16, %c0_17, %c0_18] : memref<1x4x8x17xf32, #tpu.memory_space<vmem>>, vector<1x4x8x17xf32>
    %21 = vector.shape_cast %20 : vector<1x4x8x17xf32> to vector<4x8x17xf32>
    %22 = vector.shape_cast %19 : vector<4x8x17xf32> to vector<1x4x8x17xf32>
    tpu.vector_store %arg5[%c0_15, %c0_16, %c0_17, %c0_18], %22 {strides = array<i32>} : memref<1x4x8x17xf32, #tpu.memory_space<vmem>>, vector<1x4x8x17xf32>,
    return
  }
  func.func @transform_0(%arg0: i32, %arg1: i32) -> (i32, i32, i32, i32) {
    %c0_i32 = arith.constant 0 : i32
    %c0_i32_0 = arith.constant 0 : i32
    %c0_i32_1 = arith.constant 0 : i32
    return %arg0, %arg1, %c0_i32, %c0_i32_0 : i32, i32, i32, i32
  }
  func.func @transform_1(%arg0: i32, %arg1: i32) -> (i32, i32, i32, i32) {
    %c1_i32 = arith.constant 1 : i32
    %0 = arith.addi %c1_i32, %arg1 : i32
    %c0_i32 = arith.constant 0 : i32
    %c0_i32_0 = arith.constant 0 : i32
    %c0_i32_1 = arith.constant 0 : i32
    return %arg0, %0, %c0_i32, %c0_i32_0 : i32, i32, i32, i32
  }
  func.func @transform_2(%arg0: i32, %arg1: i32) -> (i32, i32, i32, i32) {
    %c2_i32 = arith.constant 2 : i32
    %0 = arith.addi %c2_i32, %arg1 : i32
    %c0_i32 = arith.constant 0 : i32
    %c0_i32_0 = arith.constant 0 : i32
    %c0_i32_1 = arith.constant 0 : i32
    return %arg0, %0, %c0_i32, %c0_i32_0 : i32, i32, i32, i32
  }
  func.func @transform_3(%arg0: i32, %arg1: i32) -> (i32, i32, i32, i32) {
    %c0_i32 = arith.constant 0 : i32
    %c0_i32_0 = arith.constant 0 : i32
    %c0_i32_1 = arith.constant 0 : i32
    return %arg0, %arg1, %c0_i32, %c0_i32_0 : i32, i32, i32, i32
  }
}

</mosaic_0001>

<bundles_post_ra>
// kernel: tpu_custom_call.1
= control target key start
LH: loop header
LB: loop body
LE: loop exit
PB: predicated region body
PF: predicated region fallthrough
CT: control target
= control target key end

     0   :  { %s2020_s0 = inlined_call_operand.hbm [shape: f32[2,12,8,17], index: 0, kind: input, shape index: {}]   ;;  %s2021_s1 = inlined_call_operand.hbm [shape: f32[2,12,8,17], index: 1, kind: input, shape index: {}]   ;;  %s2022_s2 = inlined_call_operand.hbm [shape: f32[2,12,8,17], index: 2, kind: input, shape index: {}]   ;;  %s2023_s3 = inlined_call_operand.hbm [shape: f32[2,4,8,17], index: 3, kind: output, shape index: {}]  }
   0x1   :  { %2030 = sst [smem:[#allocation18_spill]] %s2021_s1 }
   0x2   :  { %8 = vsyncpa [#allocation3], 0 }
   0x3   :  { %10 = vsyncpa [#allocation3 + $0x1], 0 }
   0x4   :  { %11 = vsyncpa [#allocation6], 0 }
   0x5   :  { %13 = vsyncpa [#allocation6 + $0x1], 0 }
   0x6   :  { %14 = vsyncpa [#allocation4], 0 }
   0x7   :  { %16 = vsyncpa [#allocation4 + $0x1], 0  ;;  %s1558_s12 = smov 0   ;;  %s1560_s13 = smov 0  }
   0x8   :  { %s1562_s14 = smov 0   ;;  %s1564_s15 = smov 0  }
   0x9   :  { %s1566_s16 = smov 0   ;;  %s1568_s17 = smov 0  }
   0xa LB: > { %2031 = sst [smem:[#allocation12_spill]] %s1520_s14  ;;  %s1589_s18 = sadd.s32 4294967295, %s1532_s17   ;;  %s1532_s17 = sphi %s1568_s17, %s22_s17   ;;  %s1528_s16 = sphi %s1566_s16, %s2065_s16   ;;  %s1524_s15 = sphi %s1564_s15, %s2064_s15   ;;  %s1520_s14 = sphi %s1562_s14, %s2068_s14   ;;  %s1516_s13 = sphi %s1560_s13, %s2067_s13   ;;  %s1512_s12 = sphi %s1558_s12, %s2066_s12  }
   0xb   : > { %2032 = sst [smem:[#allocation13_spill]] %s1528_s16  ;;  %s1182_s19 = sadd.s32 4294967294, %s1532_s17  }
   0xc   : > { %2033 = sst [smem:[#allocation14_spill]] %s1532_s17  ;;  %s34_s20 = sadd.s32 1, %s1528_s16 }
   0xd   : > { %s43_s21 = sadd.s32 1, %s1520_s14  ;;  %p36_p0 = scmp.ge.s32.totalorder %s34_s20, 2 }
   0xe   : > { %p50_p1 = scmp.ne.s32.totalorder %s1520_s14, %s1516_s13  ;;  %p51_p2 = scmp.eq.s32.totalorder %s1532_s17, 0 }
   0xf   : > { %p56_p3 = scmp.ne.s32.totalorder %s1516_s13, %s1512_s12  ;;  %s2070_s20 = smov (%p36_p0, %s34_s20), 0 }
  0x10   : > { %2034 = sst [smem:[#allocation15_spill]] %s2070_s20  ;;  %p1601_p4 = por %p51_p2, %p50_p1 }
  0x11   : > { %p57_p5 = scmp.eq.s32.totalorder %s1589_s18, 0  ;;  %s38_s23 = ssub.s32 %s1528_s16, %s2070_s20 }
  0x12   : > { %p142_p6 = scmp.eq.s32.totalorder %s1589_s18, 1  ;;  %p41_p7 = scmp.eq.s32.totalorder %s38_s23, 0 }
  0x13   : > { %p1609_p8 = por %p57_p5, %p56_p3  ;;  %p148_p10 = scmp.eq.s32.totalorder %s1182_s19, 1 }
  0x14   : > { %p1613_p9 = por %p142_p6, %p50_p1  ;;  %p1184_p12 = scmp.ge.s32.totalorder %s1532_s17, 2 }
  0x15   : > { %s1618_s26 = scalar_select %p41_p7, %s1520_s14, %s43_s21  }
  0x16   : > { %p1620_p11 = por %p148_p10, %p56_p3  ;;  %p1253_p13 = scmp.lt.s32.totalorder %s1532_s17, 2 }
  0x17   : > { %2038 = sst [smem:[#allocation16_spill]] %s1618_s26  ;;  %s168_s28 = sand.u32 1, %s1520_s14  }
  0x18   : > { %s2039_s27 = scalar_select %p1620_p11, 1, 0 }
  0x19   : > { %s1627_s29 = sshll.u32 %s168_s28, 5  ;;  %s1630_s30 = smul.u32 96, %s1528_s16 }
  0x1a   : > { %2040 = sst [smem:[#allocation17_spill]] %s2039_s27  ;;  %p1634_p0 = pnand %p1253_p13, %p1601_p4 }
  0x1b   : > { %s192_s5 = sand.u32 1, %s1532_s17   ;;  %s2042_s1 = sld [smem:[#allocation18_spill]] }
  0x1c   : > { %s196_s10 = scalar_lea.vmem [#allocation5], %s1627_s29  ;;  %p1191_p1 = scmp.ge.s32.totalorder %s1532_s17, 1 }
  0x1d   : > { %s207_s11 = sshll.u32 %s196_s10, 4  ;;  %s193_s21 = scalar_lea.sflag [#allocation6], %s192_s5  ;;  %s208_s11 = int_to_ptr.vmem [resolvable:$true] %s207_s11 }
  0x1e   : > { %s1534_s22 = smov 128   ;;  %s1535_s23 = smov 8  }
  0x1f   : > { %p240_p2 = scmp.lt.s32.totalorder %s1532_s17, 3  ;;  %s172_s10 = scalar_lea.vmem [#allocation2], %s1627_s29 }
  0x20   : > { %s169_s5 = scalar_lea.sflag [#allocation3], %s168_s28  ;;  %s221_s26 = scalar_lea.vmem [#allocation7], %s1627_s29 }
  0x21   : > { %s1088_s8 = scalar_lea.hbm %s2042_s1, %s1630_s30  ;;  %p1648_p3 = pnand %p1191_p1, %p240_p2 }
  0x22   : > { %s1089_s9 = scalar_lea.hbm %s1088_s8, 32  ;;  %s182_s1 = sshll.u32 %s172_s10, 4  ;;  %s183_s1 = int_to_ptr.vmem [resolvable:$true] %s182_s1 }
  0x23   : > { %s205_s19 = sshll.u32 %s1089_s9, 4  ;;  %s179_s9 = scalar_lea.hbm %s2020_s0, %s1630_s30  ;;  %s206_s19 = int_to_ptr.hbm [resolvable:$true] %s205_s19 }
  0x24   : > { %1245 = dma.hbm_to_vmem [thread:$0]  (!%p1634_p0), %s206_s19, 512, %s208_s11, %s193_s21, %s1534_s22, %s1534_s22, %s1535_s23  }
  0x25   : > { %s180_s20 = sshll.u32 %s179_s9, 4  ;;  %s1097_s19 = scalar_lea.hbm %s2022_s2, %s1630_s30  ;;  %s181_s20 = int_to_ptr.hbm [resolvable:$true] %s180_s20 }
  0x26   : > { %1242 = dma.hbm_to_vmem [thread:$0]  (!%p1634_p0), %s181_s20, 512, %s183_s1, %s169_s5, %s1534_s22, %s1534_s22, %s1535_s23  }
  0x27   : > { %s232_s14 = sshll.u32 %s221_s26, 4  ;;  %s1098_s17 = scalar_lea.hbm %s1097_s19, 64  ;;  %s233_s14 = int_to_ptr.vmem [resolvable:$true] %s232_s14 }
  0x28   : > { %s230_s27 = sshll.u32 %s1098_s17, 4  ;;  %244 = sbr.rel (%p1648_p3) target bundleno = 858 (0x35a), region = 32  ;;  %s231_s27 = int_to_ptr.hbm [resolvable:$true] %s230_s27 }
  0x29   : > { %1248 = dma.hbm_to_vmem [thread:$0]  (!%p1634_p0), %s231_s27, 512, %s233_s14, %s193_s21, %s1534_s22, %s1534_s22, %s1535_s23  }
  0x2a   : > { %s1669_s28 = sand.u32 (!%p1648_p3), 1, %s1516_s13  }
  0x2b   : > { %s1672_s1 = sshll.u32 (!%p1648_p3), %s1669_s28, 5  ;;  %s247_s16 = scalar_lea.sflag (!%p1648_p3), [#allocation3], %s1669_s28 }
  0x2c   : > { %s250_s20 = scalar_lea.vmem (!%p1648_p3), [#allocation2], %s1672_s1 }
  0x2d   : > { %1499 = dma.done.wait (%p1609_p8), %s247_s16, 512  }
  0x2e   : > { %1501 = vsyncadd (%p1609_p8), %s247_s16, 4294966784  ;;  %s256_s14 = sand.u32 1, %s1589_s18   ;;  %s260_s26 = scalar_lea.vmem [#allocation5], %s1672_s1 }
  0x2f   : > { %s257_s17 = scalar_lea.sflag [#allocation6], %s256_s14 }
  0x30   : > { %1503 = dma.done.wait (%p1609_p8), %s257_s17, 1024  }
  0x31   : > { %1505 = vsyncadd (%p1609_p8), %s257_s17, 4294966272  ;;  %v312_v0 = vld [vmem:[%s250_s20 + $0x10] sm:$0xff]  ;;  %v310_v1 = vld [vmem:[%s250_s20] sm:$0xff]  ;;  %vm450_vm0 = vcmask 64512   ;;  %vm603_vm1 = vcmask 138240   ;;  %vm610_vm2 = vcmask 131072  }
  0x32   : > { %386 = vxpose.xlu0.b32.start.end [1/1] (short) (narrow) %v312_v0, 24  ;;  %322 = vxpose.xlu1.b32.start.end [1/1] (short) (narrow) %v310_v1, 24  ;;  %v314_v2 = vld [vmem:[%s260_s26] sm:$0xff]  ;;  %v316_v3 = vld [vmem:[%s260_s26 + $0x10] sm:$0xff]  ;;  %v313_v4 = vld [vmem:[%s250_s20 + $0x18] sm:$0xff]  ;;  %s1868_s18 = scalar_lea.vmem [#allocation7], %s1672_s1 }
  0x33   : > { %475 = vmatpush.msra.mxu0 %v314_v2  ;;  %545 = vmatpush.msra.mxu2 %v316_v3  ;;  %v311_v5 = vld [vmem:[%s250_s20 + $0x8] sm:$0xff]  ;;  %v317_v7 = vld [vmem:[%s260_s26 + $0x18] sm:$0xff]  ;;  %s303_s24 = scalar_lea.vmem [#allocation8], %s1672_s1  ;;  %s1229_s27 = sshll.u32 %s1524_s15, 5 }
  0x34   : > { %v315_v6 = vld [vmem:[%s260_s26 + $0x8] sm:$0xff]  ;;  %580 = vmatpush.msra.mxu3 %v317_v7  ;;  %s1039_s4 = scalar_lea.hbm %s2023_s3, %s1229_s27  ;;  %s1040_s21 = sshll.u32 %s303_s24, 4  ;;  %s1041_s21 = int_to_ptr.vmem [resolvable:$true] %s1040_s21 }
  0x35   : > { %510 = vmatpush.msra.mxu1 %v315_v6  ;;  %s1042_s22 = sshll.u32 %s1039_s4, 4  ;;  %s1026_s23 = scalar_lea.sflag [#allocation4], %s1669_s28  ;;  %s1043_s22 = int_to_ptr.hbm [resolvable:$true] %s1042_s22 }
  0x36   : > { %s1460_s6 = sshra.s32 %s1043_s22, 4  ;;  %s1466_s9 = scalar_lea.hbm %s2023_s3, 64  ;;  %s1461_s6 = int_to_ptr.hbm [resolvable:$true] %s1460_s6 }
  0x37   : > { %s1462_s15 = scalar_lea.hbm %s1461_s6, 32  ;;  %p1467_p7 = scmp.lt.s32.totalorder %s1461_s6, %s2023_s3 }
  0x38   : > { %p1463_p4 = scmp.ne.s32.totalorder %s1461_s6, %s1462_s15  ;;  %p1468_p8 = scmp.lt.s32.totalorder %s1466_s9, %s1462_s15 }
  0x3a   : > { %p1464_p5 = pnand %p1463_p4, %p1613_p9  ;;  %p1469_p10 = por %p1468_p8, %p1467_p7 }
  0x3c   : > { %p1465_p6 = pneg %p1464_p5 }
  0x3e   : > { %p1470_p13 = pnand %p1469_p10, %p1465_p6 }
  0x4a   : > { %418 = vxpose.xlu0.b32.start.end [1/1] (short) (narrow) %v313_v4, 24  ;;  %354 = vxpose.xlu1.b32.start.end [1/1] (short) (narrow) %v311_v5, 24 }
  0xd6   : > { %v402_v8 = vpop.trf.xlu0  ;;  %v338_v9 = vpop.trf.xlu1 }
  0xd7   : > { %1196 = vmatmul.msk.f32.vlgmr.msra.gmra.mxu0 %vm450_vm0, %v338_v9  ;;  %1202 = vmatmul.msk.f32.vlgmr.msra.gmra.mxu2 %vm450_vm0, %v402_v8 }
  0xde   : > { %v403_v10 = vpop.trf.xlu0  ;;  %v339_v11 = vpop.trf.xlu1 }
  0xdf   : > { %1197 = vmatmul.msk.f32.gmra.mxu0 %vm450_vm0, %v339_v11  ;;  %1203 = vmatmul.msk.f32.gmra.mxu2 %vm450_vm0, %v403_v10 }
  0xe6   : > { %v404_v12 = vpop.trf.xlu0  ;;  %v340_v13 = vpop.trf.xlu1 }
  0xe7   : > { %1198 = vmatmul.msk.f32.gmra.mxu0 %vm450_vm0, %v340_v13  ;;  %1204 = vmatmul.msk.f32.gmra.mxu2 %vm450_vm0, %v404_v12 }
  0xee   : > { %v434_v14 = vpop.trf.xlu0  ;;  %v370_v15 = vpop.trf.xlu1 }
  0xef   : > { %1199 = vmatmul.msk.f32.vlgmr.msra.gmra.mxu1 %vm450_vm0, %v370_v15  ;;  %1205 = vmatmul.msk.f32.vlgmr.msra.gmra.mxu3 %vm450_vm0, %v434_v14 }
  0xf6   : > { %v435_v16 = vpop.trf.xlu0  ;;  %v371_v17 = vpop.trf.xlu1 }
  0xf7   : > { %1200 = vmatmul.msk.f32.gmra.mxu1 %vm450_vm0, %v371_v17  ;;  %1206 = vmatmul.msk.f32.gmra.mxu3 %vm450_vm0, %v435_v16 }
  0xfe   : > { %v372_v18 = vpop.trf.xlu1  ;;  %v436_v19 = vpop.trf.xlu0 }
  0xff   : > { %1201 = vmatmul.msk.f32.gmra.mxu1 %vm450_vm0, %v372_v18  ;;  %1207 = vmatmul.msk.f32.gmra.mxu3 %vm450_vm0, %v436_v19 }
 0x154   : > { %v477_v20 = vpop.f32.mrf.mxu0 }
 0x155   : > { %v591_v46 = vmul.f32 0.35355338, %v477_v20 }
 0x157   : > { %v604_v47 = vsel %vm603_vm1, %v591_v46, -inf }
 0x15a   : > { %v547_v21 = vpop.f32.mrf.mxu2 }
 0x15b   : > { %v597_v38 = vmul.f32 0.35355338, %v547_v21 }
 0x15c   : > { %v480_v22 = vpop.f32.mrf.mxu0 }
 0x15d   : > { %v623_v39 = vsel %vm603_vm1, %v597_v38, -inf  ;;  %v592_v42 = vmul.f32 0.35355338, %v480_v22 }
 0x15f   : > { %v607_v43 = vsel %vm603_vm1, %v592_v42, -inf }
 0x162   : > { %v550_v23 = vpop.f32.mrf.mxu2 }
 0x163   : > { %v598_v24 = vmul.f32 0.35355338, %v550_v23 }
 0x164   : > { %v483_v25 = vpop.f32.mrf.mxu0 }
 0x165   : > { %v1698_v26 = vmul.f32 0.35355338, %v483_v25  ;;  %v626_v27 = vsel %vm603_vm1, %v598_v24, -inf }
 0x166   : > { %627 = vmax.xlane.f32.xlu2 %v626_v27 }
 0x167   : > { %v611_v28 = vsel %vm610_vm2, %v1698_v26, -inf }
 0x168   : > { %612 = vmax.xlane.f32.xlu0 %v611_v28 }
 0x16a   : > { %v553_v50 = vpop.f32.mrf.mxu2 }
 0x16b   : > { %v1720_v51 = vmul.f32 0.35355338, %v553_v50 }
 0x16c   : > { %v512_v29 = vpop.f32.mrf.mxu1 }
 0x16d   : > { %v1716_v48 = vmul.f32 0.35355338, %v512_v29  ;;  %v629_v53 = vsel %vm610_vm2, %v1720_v51, -inf }
 0x16f   : > { %v614_v49 = vsel %vm603_vm1, %v1716_v48, -inf }
 0x172   : > { %v582_v30 = vpop.f32.mrf.mxu3 }
 0x173   : > { %v600_v40 = vmul.f32 0.35355338, %v582_v30 }
 0x174   : > { %v515_v31 = vpop.f32.mrf.mxu1 }
 0x175   : > { %v632_v41 = vsel %vm603_vm1, %v600_v40, -inf  ;;  %v1711_v44 = vmul.f32 0.35355338, %v515_v31 }
 0x177   : > { %v617_v45 = vsel %vm603_vm1, %v1711_v44, -inf }
 0x17a   : > { %v585_v32 = vpop.f32.mrf.mxu3 }
 0x17b   : > { %v601_v33 = vmul.f32 0.35355338, %v585_v32 }
 0x17c   : > { %v518_v34 = vpop.f32.mrf.mxu1 }
 0x17d   : > { %v1703_v35 = vmul.f32 0.35355338, %v518_v34  ;;  %v635_v36 = vsel %vm603_vm1, %v601_v33, -inf }
 0x17e   : > { %636 = vmax.xlane.f32.xlu2 %v635_v36 }
 0x17f   : > { %v620_v37 = vsel %vm610_vm2, %v1703_v35, -inf }
 0x180   : > { %621 = vmax.xlane.f32.xlu1 %v620_v37 }
 0x182   : > { %v588_v52 = vpop.f32.mrf.mxu3 }
 0x183   : > { %v1724_v54 = vmul.f32 0.35355338, %v588_v52 }
 0x185   : > { %v638_v55 = vsel %vm610_vm2, %v1724_v54, -inf }
 0x186   : > { %624 = vmax.xlane.f32.xlu2 %v623_v39 }
 0x18e   : > { %633 = vmax.xlane.f32.xlu2 %v632_v41 }
 0x196   : > { %608 = vmax.xlane.f32.xlu2 %v607_v43 }
 0x19e   : > { %618 = vmax.xlane.f32.xlu2 %v617_v45 }
 0x1a6   : > { %605 = vmax.xlane.f32.xlu2 %v604_v47 }
 0x1ae   : > { %615 = vmax.xlane.f32.xlu2 %v614_v49 }
 0x1b6   : > { %630 = vmax.xlane.f32.xlu2 %v629_v53 }
 0x1be   : > { %639 = vmax.xlane.f32.xlu2 %v638_v55 }
 0x1d9   : > { %v628_v56 = vpop.xlane.xlu2 %627 }
 0x1da   : > { %v648_v0 = vsub.f32 %v598_v24, %v628_v56 }
 0x1db   : > { %v613_v11 = vpop.xlane.xlu0 %612 }
 0x1dc   : > { %v667_v3 = vmul.f32 1.442695, %v648_v0  ;;  %v643_v15 = vsub.f32 %v1698_v26, %v613_v11 }
 0x1de   : > { %v657_v18 = vmul.f32 1.442695, %v643_v15 }
 0x1f1   : > { %v637_v57 = vpop.xlane.xlu2 %636 }
 0x1f2   : > { %v651_v7 = vsub.f32 %v601_v33, %v637_v57 }
 0x1f3   : > { %v622_v19 = vpop.xlane.xlu1 %621 }
 0x1f4   : > { %v673_v10 = vmul.f32 1.442695, %v651_v7  ;;  %v646_v23 = vsub.f32 %v1703_v35, %v622_v19 }
 0x1f6   : > { %v663_v26 = vmul.f32 1.442695, %v646_v23 }
 0x1f9   : > { %v625_v58 = vpop.xlane.xlu2 %624 }
 0x1fa   : > { %v647_v59 = vsub.f32 %v597_v38, %v625_v58 }
 0x1fc   : > { %v665_v60 = vmul.f32 1.442695, %v647_v59 }
 0x1fe   : > { %1308 = vpow2.f32 %v665_v60 }
 0x201   : > { %v634_v61 = vpop.xlane.xlu2 %633 }
 0x202   : > { %v650_v62 = vsub.f32 %v600_v40, %v634_v61 }
 0x204   : > { %v1728_v63 = vpop.eup %1308  ;;  %v671_v1 = vmul.f32 1.442695, %v650_v62 }
 0x205   : > { %v695_v2 = vsel %vm603_vm1, %v1728_v63, 0.0 }
 0x206   : > { %1310 = vpow2.f32 %v671_v1  ;;  %696 = vadd.xlane.f32.xlu2 %v695_v2 }
 0x207   : > { %1312 = vpow2.f32 %v667_v3 }
 0x209   : > { %v609_v4 = vpop.xlane.xlu2 %608 }
 0x20a   : > { %v642_v5 = vsub.f32 %v592_v42, %v609_v4 }
 0x20c   : > { %v1732_v6 = vpop.eup %1310  ;;  %v655_v8 = vmul.f32 1.442695, %v642_v5 }
 0x20d   : > { %v704_v9 = vsel %vm603_vm1, %v1732_v6, 0.0  ;;  %v1736_v13 = vpop.eup %1312 }
 0x20e   : > { %1314 = vpow2.f32 %v655_v8  ;;  %705 = vadd.xlane.f32.xlu2 %v704_v9  ;;  %v698_v16 = vsel %vm603_vm1, %v1736_v13, 0.0 }
 0x20f   : > { %1316 = vpow2.f32 %v673_v10 }
 0x210   : > { %1318 = vpow2.f32 %v657_v18 }
 0x211   : > { %v619_v12 = vpop.xlane.xlu2 %618 }
 0x212   : > { %v645_v40 = vsub.f32 %v1711_v44, %v619_v12 }
 0x214   : > { %v1738_v14 = vpop.eup %1314  ;;  %v661_v43 = vmul.f32 1.442695, %v645_v40 }
 0x215   : > { %v680_v17 = vsel %vm603_vm1, %v1738_v14, 0.0  ;;  %v1745_v21 = vpop.eup %1316 }
 0x216   : > { %699 = vadd.xlane.f32.xlu2 %v698_v16  ;;  %681 = vadd.xlane.f32.xlu1 %v680_v17  ;;  %v707_v25 = vsel %vm603_vm1, %v1745_v21, 0.0  ;;  %v1750_v28 = vpop.eup %1318 }
 0x217   : > { %v683_v30 = vsel %vm610_vm2, %v1750_v28, 0.0 }
 0x219   : > { %v606_v20 = vpop.xlane.xlu2 %605 }
 0x21a   : > { %v641_v22 = vsub.f32 %v591_v46, %v606_v20 }
 0x21c   : > { %v653_v24 = vmul.f32 1.442695, %v641_v22 }
 0x21e   : > { %1320 = vpow2.f32 %v653_v24  ;;  %708 = vadd.xlane.f32.xlu2 %v707_v25 }
 0x21f   : > { %1322 = vpow2.f32 %v663_v26 }
 0x221   : > { %v616_v27 = vpop.xlane.xlu2 %615 }
 0x222   : > { %v644_v46 = vsub.f32 %v1716_v48, %v616_v27 }
 0x224   : > { %v1752_v29 = vpop.eup %1320  ;;  %v659_v49 = vmul.f32 1.442695, %v644_v46 }
 0x225   : > { %v677_v31 = vsel %vm603_vm1, %v1752_v29, 0.0  ;;  %v1758_v33 = vpop.eup %1322 }
 0x226   : > { %684 = vadd.xlane.f32.xlu2 %v683_v30  ;;  %678 = vadd.xlane.f32.xlu1 %v677_v31  ;;  %v692_v36 = vsel %vm610_vm2, %v1758_v33, 0.0 }
 0x229   : > { %v631_v32 = vpop.xlane.xlu2 %630 }
 0x22a   : > { %v649_v34 = vsub.f32 %v1720_v51, %v631_v32 }
 0x22c   : > { %v669_v35 = vmul.f32 1.442695, %v649_v34 }
 0x22e   : > { %1324 = vpow2.f32 %v669_v35  ;;  %693 = vadd.xlane.f32.xlu2 %v692_v36 }
 0x231   : > { %v640_v37 = vpop.xlane.xlu2 %639 }
 0x232   : > { %v652_v38 = vsub.f32 %v1724_v54, %v640_v37 }
 0x234   : > { %v1764_v39 = vpop.eup %1324  ;;  %v675_v41 = vmul.f32 1.442695, %v652_v38 }
 0x235   : > { %v701_v42 = vsel %vm610_vm2, %v1764_v39, 0.0 }
 0x236   : > { %1326 = vpow2.f32 %v675_v41  ;;  %702 = vadd.xlane.f32.xlu2 %v701_v42 }
 0x237   : > { %1328 = vpow2.f32 %v661_v43 }
 0x238   : > { %1330 = vpow2.f32 %v659_v49 }
 0x23c   : > { %v1769_v45 = vpop.eup %1326 }
 0x23d   : > { %v710_v47 = vsel %vm610_vm2, %v1769_v45, 0.0  ;;  %v1774_v50 = vpop.eup %1328 }
 0x23e   : > { %711 = vadd.xlane.f32.xlu2 %v710_v47  ;;  %v689_v44 = vsel %vm603_vm1, %v1774_v50, 0.0  ;;  %v1778_v51 = vpop.eup %1330 }
 0x23f   : > { %v686_v52 = vsel %vm603_vm1, %v1778_v51, 0.0 }
 0x246   : > { %690 = vadd.xlane.f32.xlu2 %v689_v44 }
 0x24e   : > { %687 = vadd.xlane.f32.xlu2 %v686_v52 }
 0x279   : > { %v1782_v53 = vpop.xlane.xlu2 %696 }
 0x281   : > { %v1784_v48 = vpop.xlane.xlu2 %705 }
 0x289   : > { %v1786_v54 = vpop.xlane.xlu2 %699  ;;  %v682_v55 = vpop.xlane.xlu1 %681 }
 0x28a   : > { %1332 = vrcp.f32 %v682_v55  ;;  %v739_v5 = vand.u32 2147483648, %v682_v55  ;;  %vm733_vm5 = vweird.f32 %v682_v55  ;;  %v737_v17 = vand.u32 2147483647, %v682_v55 }
 0x28c   : > { %v740_v19 = vor.u32 1.1754944e-38, %v739_v5  ;;  %vm738_vm11 = vcmp.eq.f32.partialorder %v737_v17, 8.507059e+37  ;;  %v814_v17 = vand.u32 2147483648, %v1782_v53 }
 0x28e   : > { %v815_v43 = vor.u32 1.1754944e-38, %v814_v17 }
 0x290   : > { %v1333_v57 = vpop.eup %1332 }
 0x291   : > { %v1788_v56 = vpop.xlane.xlu2 %708  ;;  %v729_v58 = vmul.f32 %v1333_v57, %v682_v55  ;;  %vm734_vm3 = vweird.f32 %v1333_v57 }
 0x292   : > { %vm1809_vm7 = vmor %vm733_vm5, %vm734_vm3 }
 0x293   : > { %v730_v61 = vsub.f32 1.0, %v729_v58 }
 0x295   : > { %v731_v0 = vmul.f32 %v1333_v57, %v730_v61 }
 0x297   : > { %v732_v12 = vadd.f32 %v1333_v57, %v731_v0 }
 0x299   : > { %v685_v59 = vpop.xlane.xlu2 %684  ;;  %v1790_v60 = vpop.xlane.xlu1 %678  ;;  %v736_v25 = vsel %vm1809_vm7, %v1333_v57, %v732_v12 }
 0x29a   : > { %1334 = vrcp.f32 %v685_v59  ;;  %v754_v9 = vand.u32 2147483648, %v685_v59  ;;  %v752_v11 = vand.u32 2147483647, %v685_v59  ;;  %vm748_vm6 = vweird.f32 %v685_v59 }
 0x29b   : > { %1336 = vrcp.f32 %v1790_v60  ;;  %v724_v34 = vand.u32 2147483648, %v1790_v60  ;;  %vm718_vm12 = vweird.f32 %v1790_v60  ;;  %v722_v36 = vand.u32 2147483647, %v1790_v60 }
 0x29c   : > { %1338 = vrcp.f32 %v1786_v54  ;;  %v755_v24 = vor.u32 1.1754944e-38, %v754_v9  ;;  %vm753_vm9 = vcmp.eq.f32.partialorder %v752_v11, 8.507059e+37  ;;  %v741_v47 = vsel %vm738_vm11, %v740_v19, %v736_v25 }
 0x29d   : > { %v725_v55 = vor.u32 1.1754944e-38, %v724_v34  ;;  %vm723_vm15 = vcmp.eq.f32.partialorder %v722_v36, 8.507059e+37  ;;  %v742_v57 = vmul.f32 %v1738_v14, %v741_v47 }
 0x2a0   : > { %v1335_v62 = vpop.eup %1334 }
 0x2a1   : > { %v1794_v1 = vpop.eup %1336  ;;  %v744_v2 = vmul.f32 %v1335_v62, %v685_v59  ;;  %v1796_v3 = vpop.xlane.xlu2 %693  ;;  %vm749_vm4 = vweird.f32 %v1335_v62 }
 0x2a2   : > { %v714_v4 = vmul.f32 %v1794_v1, %v1790_v60  ;;  %1340 = vrcp.f32 %v1796_v3  ;;  %v1802_v8 = vpop.eup %1338  ;;  %vm750_vm8 = vmor %vm748_vm6, %vm749_vm4  ;;  %vm719_vm10 = vweird.f32 %v1794_v1  ;;  %v799_v46 = vand.u32 2147483648, %v1796_v3 }
 0x2a3   : > { %1342 = vrcp.f32 %v1782_v53  ;;  %v745_v7 = vsub.f32 1.0, %v744_v2  ;;  %v819_v18 = vmul.f32 %v1802_v8, %v1786_v54  ;;  %vm1834_vm13 = vmor %vm718_vm12, %vm719_vm10  ;;  %v797_v44 = vand.u32 2147483647, %v1796_v3 }
 0x2a4   : > { %v715_v10 = vsub.f32 1.0, %v714_v4  ;;  %1344 = vrcp.f32 %v1784_v48  ;;  %vm793_vm0 = vweird.f32 %v1796_v3  ;;  %v800_v61 = vor.u32 1.1754944e-38, %v799_v46 }
 0x2a5   : > { %v746_v15 = vmul.f32 %v1335_v62, %v745_v7  ;;  %1346 = vrcp.f32 %v1788_v56  ;;  %v820_v42 = vsub.f32 1.0, %v819_v18  ;;  %vm798_vm3 = vcmp.eq.f32.partialorder %v797_v44, 8.507059e+37 }
 0x2a6   : > { %v716_v16 = vmul.f32 %v1794_v1, %v715_v10  ;;  %vm824_vm4 = vweird.f32 %v1802_v8  ;;  %vm823_vm6 = vweird.f32 %v1786_v54  ;;  %v829_v18 = vand.u32 2147483648, %v1786_v54 }
 0x2a7   : > { %v747_v20 = vadd.f32 %v1335_v62, %v746_v15  ;;  %v821_v0 = vmul.f32 %v1802_v8, %v820_v42  ;;  %vm808_vm12 = vweird.f32 %v1782_v53 }
 0x2a8   : > { %v1341_v23 = vpop.eup %1340  ;;  %v717_v27 = vadd.f32 %v1794_v1, %v716_v16  ;;  %v830_v36 = vor.u32 1.1754944e-38, %v829_v18 }
 0x2a9   : > { %v1816_v26 = vpop.eup %1342  ;;  %v789_v30 = vmul.f32 %v1341_v23, %v1796_v3  ;;  %v1821_v31 = vpop.xlane.xlu2 %702  ;;  %v751_v32 = vsel %vm750_vm8, %v1335_v62, %v747_v20  ;;  %vm794_vm14 = vweird.f32 %v1341_v23  ;;  %vm1877_vm8 = vmor %vm823_vm6, %vm824_vm4 }
 0x2aa   : > { %1348 = vrcp.f32 %v1821_v31  ;;  %v756_v35 = vsel %vm753_vm9, %v755_v24, %v751_v32  ;;  %v1828_v40 = vpop.eup %1344  ;;  %v804_v41 = vmul.f32 %v1816_v26, %v1782_v53  ;;  %vm795_vm2 = vmor %vm793_vm0, %vm794_vm14  ;;  %v844_v12 = vand.u32 2147483648, %v1821_v31 }
 0x2ab   : > { %v790_v37 = vsub.f32 1.0, %v789_v30  ;;  %v757_v38 = vmul.f32 %v1750_v28, %v756_v35  ;;  %v721_v28 = vsel %vm1834_vm13, %v1794_v1, %v717_v27  ;;  %v1844_v52 = vpop.eup %1346  ;;  %v849_v11 = vmul.f32 %v1828_v40, %v1784_v48 }
 0x2ac   : > { %v805_v60 = vsub.f32 1.0, %v804_v41  ;;  %v726_v62 = vsel %vm723_vm15, %v725_v55, %v721_v28  ;;  %v864_v3 = vmul.f32 %v1844_v52, %v1788_v56  ;;  %v842_v16 = vand.u32 2147483647, %v1821_v31 }
 0x2ad   : > { %v791_v49 = vmul.f32 %v1341_v23, %v790_v37  ;;  %1208 = vmatpush.xpose.msk.msrb.mxu0 %vm603_vm1, %v757_v38  ;;  %v727_v7 = vmul.f32 %v1752_v29, %v726_v62  ;;  %v822_v29 = vadd.f32 %v1802_v8, %v821_v0  ;;  %vm838_vm7 = vweird.f32 %v1821_v31 }
 0x2ae   : > { %v806_v10 = vmul.f32 %v1816_v26, %v805_v60  ;;  %v865_v19 = vsub.f32 1.0, %v864_v3  ;;  %v812_v24 = vand.u32 2147483647, %v1782_v53  ;;  %v850_v27 = vsub.f32 1.0, %v849_v11 }
 0x2af   : > { %v792_v58 = vadd.f32 %v1341_v23, %v791_v49  ;;  %v845_v30 = vor.u32 1.1754944e-38, %v844_v12  ;;  %vm809_vm10 = vweird.f32 %v1816_v26  ;;  %vm843_vm11 = vcmp.eq.f32.partialorder %v842_v16, 8.507059e+37 }
 0x2b0   : > { %v1349_v59 = vpop.eup %1348  ;;  %v807_v32 = vadd.f32 %v1816_v26, %v806_v10  ;;  %v866_v37 = vmul.f32 %v1844_v52, %v865_v19  ;;  %vm853_vm14 = vweird.f32 %v1784_v48  ;;  %vm1900_vm15 = vmor %vm808_vm12, %vm809_vm10  ;;  %vm1904_vm0 = vcmp.eq.f32.partialorder %v812_v24, 8.507059e+37 }
 0x2b1   : > { %v834_v1 = vmul.f32 %v1349_v59, %v1821_v31  ;;  %v1850_v2 = vpop.xlane.xlu2 %711  ;;  %1209 = vmatpush.xpose.msk.msrb.mxu0 %vm603_vm1, %v742_v57  ;;  %v796_v4 = vsel %vm795_vm2, %v1341_v23, %v792_v58  ;;  %vm839_vm5 = vweird.f32 %v1349_v59  ;;  %v827_v23 = vand.u32 2147483647, %v1786_v54 }
 0x2b2   : > { %1350 = vrcp.f32 %v1850_v2  ;;  %v801_v14 = vsel %vm798_vm3, %v800_v61, %v796_v4  ;;  %vm840_vm9 = vmor %vm838_vm7, %vm839_vm5  ;;  %v826_v54 = vsel %vm1877_vm8, %v1802_v8, %v822_v29  ;;  %v889_v53 = vand.u32 2147483648, %v1850_v2 }
 0x2b3   : > { %v835_v5 = vsub.f32 1.0, %v834_v1  ;;  %v802_v9 = vmul.f32 %v1758_v33, %v801_v14  ;;  %v318_v33 = vld [vmem:[%s1868_s18] sm:$0xff]  ;;  %vm828_vm13 = vcmp.eq.f32.partialorder %v827_v23, 8.507059e+37  ;;  %v851_v28 = vmul.f32 %v1828_v40, %v850_v27 }
 0x2b4   : > { %v831_v46 = vsel %vm828_vm13, %v830_v36, %v826_v54  ;;  %v887_v44 = vand.u32 2147483647, %v1850_v2  ;;  %v867_v55 = vadd.f32 %v1844_v52, %v866_v37  ;;  %vm869_vm3 = vweird.f32 %v1844_v52  ;;  %v319_v37 = vld [vmem:[%s1868_s18 + $0x8] sm:$0xff] }
 0x2b5   : > { %v836_v15 = vmul.f32 %v1349_v59, %v835_v5  ;;  %1210 = vmatpush.xpose.msk.msrb.mxu0 %vm603_vm1, %v727_v7  ;;  %1212 = vmatpush.xpose.msk.msrb.mxu1 %vm603_vm1, %v802_v9  ;;  %v874_v57 = vand.u32 2147483648, %v1788_v56  ;;  %vm883_vm4 = vweird.f32 %v1850_v2  ;;  %v832_v58 = vmul.f32 %v1736_v13, %v831_v46 }
 0x2b6   : > { %v859_v61 = vand.u32 2147483648, %v1784_v48  ;;  %vm868_vm5 = vweird.f32 %v1788_v56  ;;  %v872_v0 = vand.u32 2147483647, %v1788_v56  ;;  %v890_v1 = vor.u32 1.1754944e-38, %v889_v53 }
 0x2b7   : > { %v837_v20 = vadd.f32 %v1349_v59, %v836_v15  ;;  %vm1935_vm7 = vmor %vm868_vm5, %vm869_vm3  ;;  %vm854_vm8 = vweird.f32 %v1828_v40  ;;  %v852_v14 = vadd.f32 %v1828_v40, %v851_v28  ;;  %v875_v5 = vor.u32 1.1754944e-38, %v874_v57 }
 0x2b8   : > { %v1351_v25 = vpop.eup %1350  ;;  %1211 = vmatmul.msk.f32.vlgmr.msrb.gmra.mxu0 %vm603_vm1, %v318_v33  ;;  %v871_v56 = vsel %vm1935_vm7, %v1844_v52, %v867_v55  ;;  %vm873_vm10 = vcmp.eq.f32.partialorder %v872_v0, 8.507059e+37  ;;  %v857_v15 = vand.u32 2147483647, %v1784_v48  ;;  %vm1954_vm12 = vmor %vm853_vm14, %vm854_vm8  ;;  %v320_v33 = vld [vmem:[%s1868_s18 + $0x10] sm:$0xff]  ;;  %v860_v17 = vor.u32 1.1754944e-38, %v859_v61 }
 0x2b9   : > { %v879_v31 = vmul.f32 %v1351_v25, %v1850_v2  ;;  %v1888_v34 = vpop.xlane.xlu2 %690  ;;  %v841_v35 = vsel %vm840_vm9, %v1349_v59, %v837_v20  ;;  %vm884_vm2 = vweird.f32 %v1351_v25  ;;  %vm888_vm9 = vcmp.eq.f32.partialorder %v887_v44, 8.507059e+37 }
 0x2ba   : > { %1352 = vrcp.f32 %v1888_v34  ;;  %v846_v38 = vsel %vm843_vm11, %v845_v30, %v841_v35  ;;  %vm1924_vm6 = vmor %vm883_vm4, %vm884_vm2  ;;  %v784_v11 = vand.u32 2147483648, %v1888_v34  ;;  %v876_v29 = vsel %vm873_vm10, %v875_v5, %v871_v56 }
 0x2bb   : > { %v880_v41 = vsub.f32 1.0, %v879_v31  ;;  %v847_v42 = vmul.f32 %v1764_v39, %v846_v38  ;;  %v811_v39 = vsel %vm1900_vm15, %v1816_v26, %v807_v32  ;;  %v782_v52 = vand.u32 2147483647, %v1888_v34 }
 0x2bc   : > { %v816_v26 = vsel %vm1904_vm0, %v815_v43, %v811_v39  ;;  %vm778_vm13 = vweird.f32 %v1888_v34  ;;  %v785_v20 = vor.u32 1.1754944e-38, %v784_v11  ;;  %v877_v22 = vmul.f32 %v1745_v21, %v876_v29 }
 0x2bd   : > { %v881_v49 = vmul.f32 %v1351_v25, %v880_v41  ;;  %1216 = vmatpush.xpose.msk.msrb.mxu2 %vm603_vm1, %v847_v42  ;;  %v817_v9 = vmul.f32 %v1728_v63, %v816_v26  ;;  %vm858_vm14 = vcmp.eq.f32.partialorder %v857_v15, 8.507059e+37  ;;  %vm783_vm0 = vcmp.eq.f32.partialorder %v782_v52, 8.507059e+37 }
 0x2bf   : > { %v882_v59 = vadd.f32 %v1351_v25, %v881_v49 }
 0x2c0   : > { %v1353_v60 = vpop.eup %1352 }
 0x2c1   : > { %v774_v2 = vmul.f32 %v1353_v60, %v1888_v34  ;;  %1217 = vmatpush.xpose.msk.msrb.mxu2 %vm603_vm1, %v832_v58  ;;  %v688_v13 = vpop.xlane.xlu2 %687  ;;  %v886_v4 = vsel %vm1924_vm6, %v1351_v25, %v882_v59  ;;  %vm779_vm11 = vweird.f32 %v1353_v60  ;;  %v321_v34 = vld [vmem:[%s1868_s18 + $0x18] sm:$0xff] }
 0x2c2   : > { %1354 = vrcp.f32 %v688_v13  ;;  %v891_v10 = vsel %vm888_vm9, %v890_v1, %v886_v4  ;;  %vm780_vm15 = vmor %vm778_vm13, %vm779_vm11  ;;  %v769_v30 = vand.u32 2147483648, %v688_v13  ;;  %v767_v21 = vand.u32 2147483647, %v688_v13 }
 0x2c3   : > { %v775_v7 = vsub.f32 1.0, %v774_v2  ;;  %v892_v12 = vmul.f32 %v1769_v45, %v891_v10  ;;  %v856_v45 = vsel %vm1954_vm12, %v1828_v40, %v852_v14  ;;  %vm763_vm3 = vweird.f32 %v688_v13 }
 0x2c4   : > { %v861_v24 = vsel %vm858_vm14, %v860_v17, %v856_v45  ;;  %v770_v54 = vor.u32 1.1754944e-38, %v769_v30  ;;  %vm768_vm5 = vcmp.eq.f32.partialorder %v767_v21, 8.507059e+37 }
 0x2c5   : > { %v776_v16 = vmul.f32 %v1353_v60, %v775_v7  ;;  %1218 = vmatpush.xpose.msk.msrb.mxu2 %vm603_vm1, %v817_v9  ;;  %1220 = vmatpush.xpose.msk.msrb.mxu3 %vm603_vm1, %v892_v12  ;;  %v862_v32 = vmul.f32 %v1732_v6, %v861_v24 }
 0x2c7   : > { %v777_v18 = vadd.f32 %v1353_v60, %v776_v16 }
 0x2c8   : > { %v1355_v19 = vpop.eup %1354  ;;  %1219 = vmatmul.msk.f32.vlgmr.msrb.gmra.mxu2 %vm603_vm1, %v320_v33 }
 0x2c9   : > { %v759_v48 = vmul.f32 %v1355_v19, %v688_v13  ;;  %v781_v23 = vsel %vm780_vm15, %v1353_v60, %v777_v18  ;;  %1221 = vmatpush.xpose.msk.msrb.mxu3 %vm603_vm1, %v877_v22  ;;  %vm764_vm2 = vweird.f32 %v1355_v19 }
 0x2ca   : > { %v786_v40 = vsel %vm783_vm0, %v785_v20, %v781_v23  ;;  %vm765_vm4 = vmor %vm763_vm3, %vm764_vm2 }
 0x2cb   : > { %v760_v25 = vsub.f32 1.0, %v759_v48  ;;  %v787_v27 = vmul.f32 %v1774_v50, %v786_v40 }
 0x2cd   : > { %v761_v31 = vmul.f32 %v1355_v19, %v760_v25  ;;  %1213 = vmatpush.xpose.msk.msrb.mxu1 %vm603_vm1, %v787_v27  ;;  %1222 = vmatpush.xpose.msk.msrb.mxu3 %vm603_vm1, %v862_v32 }
 0x2cf   : > { %v762_v35 = vadd.f32 %v1355_v19, %v761_v31 }
 0x2d0   : > { %1223 = vmatmul.msk.f32.vlgmr.msrb.gmra.mxu3 %vm603_vm1, %v321_v34 }
 0x2d1   : > { %v766_v50 = vsel %vm765_vm4, %v1355_v19, %v762_v35 }
 0x2d2   : > { %v771_v6 = vsel %vm768_vm5, %v770_v54, %v766_v50 }
 0x2d3   : > { %v772_v36 = vmul.f32 %v1778_v51, %v771_v6 }
 0x2d5   : > { %1214 = vmatpush.xpose.msk.msrb.mxu1 %vm603_vm1, %v772_v36 }
 0x2d8   : > { %1215 = vmatmul.msk.f32.vlgmr.msrb.gmra.mxu1 %vm603_vm1, %v319_v37 }
 0x335   : > { %v922_v38 = vpop.f32.mrf.mxu0 }
 0x336   : > { %1021 = vst.msk [vmem:[%s303_s24] sm:$0xff] %vm603_vm1, %v922_v38 }
 0x34b   : > { %v986_v41 = vpop.f32.mrf.mxu2 }
 0x34c   : > { %1023 = vst.msk [vmem:[%s303_s24 + $0x10] sm:$0xff] %vm603_vm1, %v986_v41 }
 0x353   : > { %v1018_v51 = vpop.f32.mrf.mxu3 }
 0x354   : > { %1024 = vst.msk [vmem:[%s303_s24 + $0x18] sm:$0xff] %vm603_vm1, %v1018_v51 }
 0x355   : > { %v954_v42 = vpop.f32.mrf.mxu1 }
 0x356   : > { %1022 = vst.msk [vmem:[%s303_s24 + $0x8] sm:$0xff] %vm603_vm1, %v954_v42 }
 0x357   : > { %1473 = shalt.err (!%p1470_p13)
}
 0x358   : > { %s1536_s11 = smov 128   ;;  %s1537_s19 = smov 8  }
 0x359   : > { %1237 = dma.vmem_to_hbm [thread:$0]  (%p1613_p9), %s1041_s21, 512, %s1043_s22, %s1026_s23, %s1536_s11, %s1536_s11, %s1537_s19  }
 0x35a PF: > { %s2061_s1 = sld [smem:[#allocation14_spill]]  ;;  %s1057_s16 = sand.u32 1, %s1512_s12  }
 0x35b   : > { %p1250_p0 = pnand %p1184_p12, %p1620_p11  ;;  %s1058_s20 = scalar_lea.sflag [#allocation4], %s1057_s16 }
 0x35d   : > { %p1251_p1 = pneg %p1250_p0 }
 0x35f   : > { %1507 = dma.done.wait (%p1251_p1), %s1058_s20, 512  }
 0x360   : > { %1509 = vsyncadd (%p1251_p1), %s1058_s20, 4294966784  ;;  %s22_s17 = sadd.s32 1, %s2061_s1   ;;  %s2062_s14 = sld [smem:[#allocation12_spill]] }
 0x361   : > { %p19_p2 = scmp.ge.s32.totalorder %s22_s17, 4   ;;  %s2063_s26 = sld [smem:[#allocation16_spill]] }
 0x362   : > { %s2064_s15 = sld [smem:[#allocation13_spill]]  ;;  %s2066_s12 = smov %s1516_s13 }
 0x363   : > { %s2065_s16 = sld [smem:[#allocation15_spill]]  ;;  %21 = sbr.rel (!%p19_p2) target bundleno = 10 (0xa), region = 101 }
 0x366   : > { %s2067_s13 = smov %s2062_s14 }
 0x367   : > { %s2068_s14 = smov %s2063_s26 }
 0x368   :  { %1064 = vsyncpa [#allocation3], 1 }
 0x369   :  { %1066 = vsyncpa [#allocation3 + $0x1], 1 }
 0x36a   :  { %1067 = vsyncpa [#allocation6], 1 }
 0x36b   :  { %1069 = vsyncpa [#allocation6 + $0x1], 1 }
 0x36c   :  { %1070 = vsyncpa [#allocation4], 1 }
 0x36d   :  { %1072 = vsyncpa [#allocation4 + $0x1], 1 }

</bundles_post_ra>
